<compile_context>
chip_gen: v6e
topology: v6e:2x2x1
jax: 0.10.0
libtpu: 0.0.40
codegen_flags: <defaults>
</compile_context>

<pallas_src>
import functools
import math

import jax
import jax.numpy as jnp
from jax import lax
from jax.experimental import pallas as pl
from jax.experimental.pallas import tpu as pltpu


def _concat_position_ln_kernel(x_ref, pos_ref, params_ref, out_ref, *, eps):
    # x_ref:      (TB, TS, D2)  activations tile
    # pos_ref:    (TS, D2)      position rows, shared across the batch tile
    # params_ref: (4, D2)       rows = [gamma_x, gamma_pos, beta_x, beta_pos]
    # out_ref:    (TB, TS, 2*D2)
    x = x_ref[...].astype(jnp.float32)           # (TB, TS, D2)
    pos = pos_ref[...].astype(jnp.float32)       # (TS, D2)
    p = params_ref[...].astype(jnp.float32)      # (4, D2)

    d2 = x.shape[-1]
    d_model = out_ref.shape[-1]
    inv_d = 1.0 / d_model

    # Position-half statistics: computed ONCE per tile (shared over TB) instead
    # of re-reducing (pos - mean)^2 for every batch element.
    sum_p = jnp.sum(pos, axis=-1, keepdims=True)            # (TS, 1)
    sumsq_p = jnp.sum(pos * pos, axis=-1, keepdims=True)     # (TS, 1)

    sum_x = jnp.sum(x, axis=-1, keepdims=True)               # (TB, TS, 1)
    mean = (sum_x + sum_p[None, :, :]) * inv_d               # (TB, TS, 1)

    cx = x - mean                                            # (TB, TS, D2)
    varsum_x = jnp.sum(cx * cx, axis=-1, keepdims=True)      # (TB, TS, 1)
    # sum((pos - mean)^2) = sumsq_p - 2*mean*sum_p + d2*mean^2   (hoisted)
    varsum_p = (sumsq_p[None, :, :]
                - 2.0 * mean * sum_p[None, :, :]
                + d2 * mean * mean)                          # (TB, TS, 1)
    rstd = lax.rsqrt((varsum_x + varsum_p) * inv_d + eps)    # (TB, TS, 1)

    gx = p[0:1, :]   # (1, D2) — broadcasts over (TB, TS, D2)
    gp = p[1:2, :]
    bx = p[2:3, :]
    bp = p[3:4, :]

    # Two lane-range stores implement the concat; dense when d2 % 128 == 0.
    out_ref[:, :, 0:d2] = (cx * rstd * gx + bx).astype(out_ref.dtype)
    cp = pos[None, :, :] - mean                              # only for the write
    out_ref[:, :, d2:d_model] = (cp * rstd * gp + bp).astype(out_ref.dtype)


_TARGET_ROWS = 1024  # ~512-1024 rows/step amortizes the ~0.35us per-step overhead


def _vmem_budget_bytes():
    """Generation-aware VMEM budget: ~75% of physical per-core VMEM.

    ~48 MiB on v7x (64 MiB physical), ~96 MiB on v5e/v6e (128 MiB physical),
    leaving headroom for compiler scratch, semaphores and temporaries.
    """
    cap = 128 * 2**20
    try:
        info = pltpu.get_tpu_info()
        cap = int(getattr(info, "vmem_capacity_bytes", 0)) or cap
    except Exception:
        pass
    return int(cap * 0.75)


def _pick_tiles(B, S, D2, D, in_bytes, out_bytes, budget):
    """VMEM-aware (TS, TB) selection.  TS is a multiple of 8 unless TS == S."""
    # Resident bytes per (batch, seq) row per grid step:
    #   double-buffered x-in + out blocks, plus f32 temporaries
    #   (x, cx, cp ~ 3*D2 and the staged output half-writes ~ D).
    per_row = 2 * (D2 * in_bytes + D * out_bytes) + (3 * D2 + D) * 4
    max_rows = max(8, budget // max(per_row, 1))
    target = int(min(max_rows, _TARGET_ROWS))

    if S <= target:
        TS = S                                   # full-dim block: always legal
    else:
        TS = min(max(8, (target // 8) * 8), (S // 8) * 8)
    TB = max(1, min(B, target // max(TS, 1)))

    # v7x has 2 TensorCores per chip: guarantee >= 2 grid steps for non-trivial
    # workloads so both cores contribute HBM bandwidth.
    def n_steps(ts, tb):
        return math.ceil(S / ts) * math.ceil(B / tb)

    if n_steps(TS, TB) == 1 and B * S > 256:
        if B >= 2:
            TB = math.ceil(B / 2)
        elif S >= 16:
            TS = max(8, (math.ceil(S / 2) // 8) * 8)
    return TS, TB


def concat_position(x, position_table, gamma, beta, *, eps=1e-5):
    """x: [B, S, d_model//2]; position_table: [num_pos, d_model//2];
    gamma/beta: [d_model].  Returns LayerNorm(cat([x, pos[:S]], -1))."""
    B, S, D2 = x.shape
    num_pos, d2_tbl = position_table.shape
    D = 2 * D2
    assert d2_tbl == D2, "position table width must equal d_model // 2"
    assert S <= num_pos, "sequence length exceeds position table size"
    assert gamma.shape == (D,) and beta.shape == (D,)

    # The whole "lookup" is a static contiguous slice of the table.
    pos = position_table[:S]

    # Fused LayerNorm affine params, pre-split per half so the kernel never
    # lane-slices at an unaligned offset: rows [gamma_x, gamma_pos, beta_x, beta_pos].
    params = jnp.stack([gamma[:D2], gamma[D2:], beta[:D2], beta[D2:]], axis=0)

    budget = _vmem_budget_bytes()
    in_bytes = jnp.dtype(x.dtype).itemsize
    TS, TB = _pick_tiles(B, S, D2, D, in_bytes, in_bytes, budget)

    # Batch axis innermost (fastest varying) -> the position tile's block index
    # (s, 0) is constant across consecutive steps and its DMA is elided.
    grid = (math.ceil(S / TS), math.ceil(B / TB))

    # NOTE: for full speed d_model//2 should be a multiple of 128 so both output
    # half-stores are lane-dense; otherwise the stores fall back to masked vst.
    kernel = functools.partial(_concat_position_ln_kernel, eps=eps)
    return pl.pallas_call(
        kernel,
        out_shape=jax.ShapeDtypeStruct((B, S, D), x.dtype),
        grid=grid,
        in_specs=[
            pl.BlockSpec((TB, TS, D2), lambda s, b: (b, s, 0)),   # x
            pl.BlockSpec((TS, D2), lambda s, b: (s, 0)),          # position rows
            pl.BlockSpec((4, D2), lambda s, b: (0, 0)),           # LN affine params
        ],
        out_specs=pl.BlockSpec((TB, TS, D), lambda s, b: (b, s, 0)),
        compiler_params=pltpu.CompilerParams(
            dimension_semantics=("parallel", "parallel"),
            vmem_limit_bytes=int(budget)),
    )(x, pos, params)


if __name__ == "__main__":
    # Small shapes consistent with the module's forward.
    B, S, d_model = 2, 8, 32
    D2 = d_model // 2

    key = jax.random.PRNGKey(0)
    kx, kp, kg, kb = jax.random.split(key, 4)

    x = jax.random.normal(kx, (B, S, D2), dtype=jnp.float32)
    # nn.Parameter(torch.FloatTensor(510 + 2, d_model // 2)) with normal_ init.
    position_table = jax.random.normal(kp, (512, D2), dtype=jnp.float32)
    # nn.LayerNorm default init is ones/zeros; use non-trivial values to make
    # the correctness check stronger.
    gamma = 1.0 + 0.1 * jax.random.normal(kg, (d_model,), dtype=jnp.float32)
    beta = 0.1 * jax.random.normal(kb, (d_model,), dtype=jnp.float32)

    out = jax.block_until_ready(concat_position(x, position_table, gamma, beta))

    # Pure-JAX reference of the PyTorch forward.
    pos_b = jnp.broadcast_to(position_table[None, :S, :], (B, S, D2))
    cat = jnp.concatenate([x, pos_b], axis=-1)
    mean = cat.mean(axis=-1, keepdims=True)
    var = ((cat - mean) ** 2).mean(axis=-1, keepdims=True)
    ref = (cat - mean) / jnp.sqrt(var + 1e-5) * gamma + beta

    assert out.shape == (B, S, d_model)
    max_err = float(jnp.max(jnp.abs(out - ref)))
    assert jnp.allclose(out, ref, atol=1e-4, rtol=1e-4), max_err

    print("KERNEL_OK")
</pallas_src>

<mosaic_0001>
module attributes {stable_mosaic.version = 11 : i64} {
  func.func @_concat_position_ln_kernel(%arg0: i32, %arg1: i32, %arg2: memref<2x8x16xf32, #tpu.memory_space<vmem>>, %arg3: memref<8x16xf32, #tpu.memory_space<vmem>>, %arg4: memref<4x16xf32, #tpu.memory_space<vmem>>, %arg5: memref<2x8x32xf32, #tpu.memory_space<vmem>>) attributes {dimension_semantics = [#tpu.dimension_semantics<parallel>, #tpu.dimension_semantics<parallel>], iteration_bounds = array<i64: 1, 1>, scalar_prefetch = 0 : i64, scratch_operands = 0 : i64, tpu.core_type = #tpu.core_type<tc>, window_params = [{transform_indices = @transform_0, window_bounds = array<i64: 2, 8, 16>}, {transform_indices = @transform_1, window_bounds = array<i64: 8, 16>}, {pipeline_mode = #tpu.pipeline_mode<synchronous>, transform_indices = @transform_2, window_bounds = array<i64: 4, 16>}, {transform_indices = @transform_3, window_bounds = array<i64: 2, 8, 32>}]} {
    %c0 = arith.constant 0 : index
    %c0_0 = arith.constant 0 : index
    %c0_1 = arith.constant 0 : index
    %0 = vector.load %arg2[%c0, %c0_0, %c0_1] : memref<2x8x16xf32, #tpu.memory_space<vmem>>, vector<2x8x16xf32>
    %c0_2 = arith.constant 0 : index
    %c0_3 = arith.constant 0 : index
    %1 = vector.load %arg3[%c0_2, %c0_3] : memref<8x16xf32, #tpu.memory_space<vmem>>, vector<8x16xf32>
    %c0_4 = arith.constant 0 : index
    %c0_5 = arith.constant 0 : index
    %2 = vector.load %arg4[%c0_4, %c0_5] : memref<4x16xf32, #tpu.memory_space<vmem>>, vector<4x16xf32>
    %cst = arith.constant dense<0.000000e+00> : vector<8xf32>
    %3 = vector.multi_reduction <add>, %1, %cst [1] : vector<8x16xf32> to vector<8xf32>
    %4 = vector.shape_cast %3 : vector<8xf32> to vector<8x1xf32>
    %5 = arith.mulf %1, %1 : vector<8x16xf32>
    %cst_6 = arith.constant dense<0.000000e+00> : vector<8xf32>
    %6 = vector.multi_reduction <add>, %5, %cst_6 [1] : vector<8x16xf32> to vector<8xf32>
    %7 = vector.shape_cast %6 : vector<8xf32> to vector<8x1xf32>
    %cst_7 = arith.constant dense<0.000000e+00> : vector<2x8xf32>
    %8 = vector.multi_reduction <add>, %0, %cst_7 [2] : vector<2x8x16xf32> to vector<2x8xf32>
    %9 = vector.shape_cast %8 : vector<2x8xf32> to vector<2x8x1xf32>
    %10 = vector.shape_cast %4 : vector<8x1xf32> to vector<1x8x1xf32>
    %11 = vector.broadcast %10 : vector<1x8x1xf32> to vector<2x8x1xf32>
    %12 = arith.addf %9, %11 : vector<2x8x1xf32>
    %cst_8 = arith.constant 3.125000e-02 : f32
    %13 = vector.broadcast %cst_8 : f32 to vector<2x8x1xf32>
    %14 = arith.mulf %12, %13 : vector<2x8x1xf32>
    %15 = vector.broadcast %14 : vector<2x8x1xf32> to vector<2x8x16xf32>
    %16 = arith.subf %0, %15 : vector<2x8x16xf32>
    %17 = arith.mulf %16, %16 : vector<2x8x16xf32>
    %cst_9 = arith.constant dense<0.000000e+00> : vector<2x8xf32>
    %18 = vector.multi_reduction <add>, %17, %cst_9 [2] : vector<2x8x16xf32> to vector<2x8xf32>
    %19 = vector.shape_cast %18 : vector<2x8xf32> to vector<2x8x1xf32>
    %20 = vector.shape_cast %7 : vector<8x1xf32> to vector<1x8x1xf32>
    %cst_10 = arith.constant 2.000000e+00 : f32
    %21 = vector.broadcast %cst_10 : f32 to vector<2x8x1xf32>
    %22 = arith.mulf %21, %14 : vector<2x8x1xf32>
    %23 = vector.shape_cast %4 : vector<8x1xf32> to vector<1x8x1xf32>
    %24 = vector.broadcast %23 : vector<1x8x1xf32> to vector<2x8x1xf32>
    %25 = arith.mulf %22, %24 : vector<2x8x1xf32>
    %26 = vector.broadcast %20 : vector<1x8x1xf32> to vector<2x8x1xf32>
    %27 = arith.subf %26, %25 : vector<2x8x1xf32>
    %cst_11 = arith.constant 1.600000e+01 : f32
    %28 = vector.broadcast %cst_11 : f32 to vector<2x8x1xf32>
    %29 = arith.mulf %28, %14 : vector<2x8x1xf32>
    %30 = arith.mulf %29, %14 : vector<2x8x1xf32>
    %31 = arith.addf %27, %30 : vector<2x8x1xf32>
    %32 = arith.addf %19, %31 : vector<2x8x1xf32>
    %cst_12 = arith.constant 3.125000e-02 : f32
    %33 = vector.broadcast %cst_12 : f32 to vector<2x8x1xf32>
    %34 = arith.mulf %32, %33 : vector<2x8x1xf32>
    %cst_13 = arith.constant 9.99999974E-6 : f32
    %35 = vector.broadcast %cst_13 : f32 to vector<2x8x1xf32>
    %36 = arith.addf %34, %35 : vector<2x8x1xf32>
    %37 = math.rsqrt %36 : vector<2x8x1xf32>
    %38 = vector.extract_strided_slice %2 {offsets = [0, 0], sizes = [1, 16], strides = [1, 1]} : vector<4x16xf32> to vector<1x16xf32>
    %39 = vector.extract_strided_slice %2 {offsets = [1, 0], sizes = [1, 16], strides = [1, 1]} : vector<4x16xf32> to vector<1x16xf32>
    %40 = vector.extract_strided_slice %2 {offsets = [2, 0], sizes = [1, 16], strides = [1, 1]} : vector<4x16xf32> to vector<1x16xf32>
    %41 = vector.extract_strided_slice %2 {offsets = [3, 0], sizes = [1, 16], strides = [1, 1]} : vector<4x16xf32> to vector<1x16xf32>
    %42 = vector.broadcast %37 : vector<2x8x1xf32> to vector<2x8x16xf32>
    %43 = arith.mulf %16, %42 : vector<2x8x16xf32>
    %44 = vector.shape_cast %38 : vector<1x16xf32> to vector<1x1x16xf32>
    %45 = vector.broadcast %44 : vector<1x1x16xf32> to vector<2x8x16xf32>
    %46 = arith.mulf %43, %45 : vector<2x8x16xf32>
    %47 = vector.shape_cast %40 : vector<1x16xf32> to vector<1x1x16xf32>
    %48 = vector.broadcast %47 : vector<1x1x16xf32> to vector<2x8x16xf32>
    %49 = arith.addf %46, %48 : vector<2x8x16xf32>
    %c0_14 = arith.constant 0 : index
    %c0_15 = arith.constant 0 : index
    %c0_16 = arith.constant 0 : index
    %50 = vector.load %arg5[%c0_14, %c0_15, %c0_16] : memref<2x8x32xf32, #tpu.memory_space<vmem>>, vector<2x8x16xf32>
    tpu.vector_store %arg5[%c0_14, %c0_15, %c0_16], %49 {strides = array<i32>} : memref<2x8x32xf32, #tpu.memory_space<vmem>>, vector<2x8x16xf32>,
    %51 = vector.shape_cast %1 : vector<8x16xf32> to vector<1x8x16xf32>
    %52 = vector.broadcast %51 : vector<1x8x16xf32> to vector<2x8x16xf32>
    %53 = vector.broadcast %14 : vector<2x8x1xf32> to vector<2x8x16xf32>
    %54 = arith.subf %52, %53 : vector<2x8x16xf32>
    %55 = vector.broadcast %37 : vector<2x8x1xf32> to vector<2x8x16xf32>
    %56 = arith.mulf %54, %55 : vector<2x8x16xf32>
    %57 = vector.shape_cast %39 : vector<1x16xf32> to vector<1x1x16xf32>
    %58 = vector.broadcast %57 : vector<1x1x16xf32> to vector<2x8x16xf32>
    %59 = arith.mulf %56, %58 : vector<2x8x16xf32>
    %60 = vector.shape_cast %41 : vector<1x16xf32> to vector<1x1x16xf32>
    %61 = vector.broadcast %60 : vector<1x1x16xf32> to vector<2x8x16xf32>
    %62 = arith.addf %59, %61 : vector<2x8x16xf32>
    %c0_17 = arith.constant 0 : index
    %c0_18 = arith.constant 0 : index
    %c16 = arith.constant 16 : index
    %63 = vector.load %arg5[%c0_17, %c0_18, %c16] : memref<2x8x32xf32, #tpu.memory_space<vmem>>, vector<2x8x16xf32>
    tpu.vector_store %arg5[%c0_17, %c0_18, %c16], %62 {strides = array<i32>} : memref<2x8x32xf32, #tpu.memory_space<vmem>>, vector<2x8x16xf32>,
    return
  }
  func.func @transform_0(%arg0: i32, %arg1: i32) -> (i32, i32, i32) {
    %c0_i32 = arith.constant 0 : i32
    %c0_i32_0 = arith.constant 0 : i32
    return %arg1, %arg0, %c0_i32 : i32, i32, i32
  }
  func.func @transform_1(%arg0: i32, %arg1: i32) -> (i32, i32) {
    %c0_i32 = arith.constant 0 : i32
    %c0_i32_0 = arith.constant 0 : i32
    return %arg0, %c0_i32 : i32, i32
  }
  func.func @transform_2(%arg0: i32, %arg1: i32) -> (i32, i32) {
    %c0_i32 = arith.constant 0 : i32
    %c0_i32_0 = arith.constant 0 : i32
    %c0_i32_1 = arith.constant 0 : i32
    return %c0_i32, %c0_i32_0 : i32, i32
  }
  func.func @transform_3(%arg0: i32, %arg1: i32) -> (i32, i32, i32) {
    %c0_i32 = arith.constant 0 : i32
    %c0_i32_0 = arith.constant 0 : i32
    return %arg1, %arg0, %c0_i32 : i32, i32, i32
  }
}

</mosaic_0001>

<bundles_post_ra>
// kernel: tpu_custom_call.1
= control target key start
LH: loop header
LB: loop body
LE: loop exit
PB: predicated region body
PF: predicated region fallthrough
CT: control target
= control target key end

     0   :  { %8 = vsyncpa [#allocation3], 0  ;;  %s322_s0 = inlined_call_operand.hbm [shape: f32[2,8,16], index: 0, kind: input, shape index: {}]   ;;  %s323_s1 = inlined_call_operand.hbm [shape: f32[8,16], index: 1, kind: input, shape index: {}]   ;;  %s324_s2 = inlined_call_operand.hbm [shape: f32[4,16], index: 2, kind: input, shape index: {}]   ;;  %s325_s3 = inlined_call_operand.hbm [shape: f32[2,8,32], index: 3, kind: output, shape index: {}]  }
   0x1   :  { %9 = vsyncpa [#allocation6], 0 }
   0x2   :  { %10 = vsyncpa [#allocation4], 0  ;;  %s262_s12 = smov [#allocation5]   ;;  %s263_s14 = smov [#allocation2]  }
   0x3   :  { %s29_s13 = sshll.u32 %s262_s12, 4  ;;  %s16_s15 = sshll.u32 %s263_s14, 4  ;;  %s30_s13 = int_to_ptr.vmem [resolvable:$true] %s29_s13  ;;  %s17_s15 = int_to_ptr.vmem [resolvable:$true] %s16_s15 }
   0x4   :  { %s184_s16 = scalar_lea.vmem %s30_s13, 128  ;;  %p189_p1 = scmp.lt.s32.totalorder %s30_s13, %s30_s13 }
   0x5   :  { %p185_p0 = scmp.ne.s32.totalorder %s30_s13, %s184_s16  ;;  %p190_p2 = scmp.lt.s32.totalorder %s184_s16, %s184_s16 }
   0x7   :  { %p191_p3 = por %p190_p2, %p189_p1 }
   0x9   :  { %p192_p4 = pnand %p191_p3, %p185_p0 }
   0xb   :  { %195 = shalt.err (!%p192_p4)
}
   0xc   :  { %32 = dma.hbm_to_vmem [thread:$0]  %s323_s1, 128, %s30_s13, [#allocation6]  }
   0xd   :  { %s204_s19 = scalar_lea.vmem %s17_s15, 256  ;;  %p209_p6 = scmp.lt.s32.totalorder %s17_s15, %s17_s15 }
   0xe   :  { %p205_p5 = scmp.ne.s32.totalorder %s17_s15, %s204_s19  ;;  %p210_p7 = scmp.lt.s32.totalorder %s204_s19, %s204_s19 }
  0x10   :  { %p211_p8 = por %p210_p7, %p209_p6 }
  0x12   :  { %p212_p9 = pnand %p211_p8, %p205_p5 }
  0x14   :  { %215 = shalt.err (!%p212_p9)
}
  0x15   :  { %s264_s20 = smov 128   ;;  %s265_s21 = smov 8  }
  0x16   :  { %22 = dma.hbm_to_vmem [thread:$0]  %s322_s0, 256, %s17_s15, [#allocation3], %s264_s20, %s264_s20, %s265_s21  }
  0x17   :  { %s266_s24 = smov [#allocation7]  }
  0x18   :  { %s39_s25 = sshll.u32 %s266_s24, 4  ;;  %s40_s25 = int_to_ptr.vmem [resolvable:$true] %s39_s25 }
  0x19   :  { %s224_s1 = scalar_lea.vmem %s40_s25, 64  ;;  %p229_p11 = scmp.lt.s32.totalorder %s40_s25, %s40_s25 }
  0x1a   :  { %p225_p10 = scmp.ne.s32.totalorder %s40_s25, %s224_s1  ;;  %p230_p12 = scmp.lt.s32.totalorder %s224_s1, %s224_s1 }
  0x1c   :  { %p231_p13 = por %p230_p12, %p229_p11 }
  0x1e   :  { %p232_p0 = pnand %p231_p13, %p225_p10 }
  0x20   :  { %235 = shalt.err (!%p232_p0)
}
  0x21   :  { %42 = dma.hbm_to_vmem [thread:$0]  %s324_s2, 64, %s40_s25, [#allocation6]  }
  0x22   :  { %256 = dma.done.wait [#allocation3], 256  }
  0x23   :  { %257 = vsyncadd [#allocation3], 4294967040 }
  0x24   :  { %258 = dma.done.wait [#allocation6], 192  }
  0x25   :  { %259 = vsyncadd [#allocation6], 4294967104  ;;  %vm56_vm0 = vcmask 130048   ;;  %v301_v0 = vld [vmem:[#allocation5] sm:$0xff]  ;;  %v53_v1 = vld [vmem:[#allocation2 + $0x8] sm:$0xff]  ;;  %v106_v41 = vlaneseq  ;;  %s267_s0 = smov 16  }
  0x26   :  { %v52_v2 = vld [vmem:[#allocation2] sm:$0xff]  ;;  %v57_v3 = vsel %vm56_vm0, %v301_v0, 0.0  ;;  %v67_v4 = vsel %vm56_vm0, %v53_v1, 0.0  ;;  %v60_v5 = vmul.f32 %v301_v0, %v301_v0  ;;  %v55_v46 = vld [vmem:[#allocation7] sm:$0xf]  ;;  %vm144_vm1 = vcmask 261248  }
  0x27   :  { %58 = vadd.xlane.f32.xlu0 %v57_v3  ;;  %68 = vadd.xlane.f32.xlu1 %v67_v4  ;;  %v64_v6 = vsel %vm56_vm0, %v52_v2, 0.0  ;;  %v107_v43 = vshrl.u32 %v106_v41, 7  ;;  %s268_s2 = smov [#allocation8]  }
  0x28   :  { %v61_v7 = vsel %vm56_vm0, %v60_v5, 0.0  ;;  %s152_s28 = sshll.u32 %s268_s2, 4  ;;  %s153_s28 = int_to_ptr.vmem [resolvable:$true] %s152_s28 }
  0x29   :  { %v108_v44 = vsub.s32 0, %v107_v43  ;;  %v126_v45 = vsub.s32 1, %v107_v43  ;;  %v132_v47 = vsub.s32 3, %v107_v43  ;;  %v114_v48 = vsub.s32 2, %v107_v43  ;;  %s236_s29 = scalar_lea.vmem %s153_s28, 256  ;;  %p241_p2 = scmp.lt.s32.totalorder %s153_s28, %s153_s28 }
  0x2a   :  { %p237_p1 = scmp.ne.s32.totalorder %s153_s28, %s236_s29  ;;  %p242_p3 = scmp.lt.s32.totalorder %s236_s29, %s236_s29 }
  0x2b   :  { %65 = vadd.xlane.f32.xlu0 %v64_v6  ;;  %62 = vadd.xlane.f32.xlu1 %v61_v7  ;;  %v109_v49 = vrot.slane %v55_v46, %v108_v44  ;;  %v127_v51 = vrot.slane %v55_v46, %v126_v45  ;;  %v133_v54 = vrot.slane %v55_v46, %v132_v47 }
  0x2c   :  { %v115_v56 = vrot.slane %v55_v46, %v114_v48  ;;  %p243_p4 = por %p242_p3, %p241_p2 }
  0x2e   :  { %p244_p5 = pnand %p243_p4, %p237_p1 }
  0xb0   :  { %v59_v8 = vpop.xlane.xlu0 %58  ;;  %v69_v9 = vpop.xlane.xlu1 %68 }
  0xb1   :  { %v71_v10 = vadd.f32 %v69_v9, %v59_v8 }
  0xb3   :  { %v73_v11 = vmul.f32 0.03125, %v71_v10 }
  0xb4   :  { %v66_v12 = vpop.xlane.xlu0 %65  ;;  %v63_v17 = vpop.xlane.xlu1 %62 }
  0xb5   :  { %v70_v13 = vadd.f32 %v66_v12, %v59_v8  ;;  %v85_v14 = vmul.f32 2.0, %v73_v11  ;;  %v75_v15 = vsub.f32 %v53_v1, %v73_v11  ;;  %v91_v16 = vmul.f32 16.0, %v73_v11 }
  0xb6   :  { %v121_v50 = vsub.f32 %v301_v0, %v73_v11 }
  0xb7   :  { %v72_v18 = vmul.f32 0.03125, %v70_v13  ;;  %v87_v19 = vmul.f32 %v85_v14, %v59_v8  ;;  %v77_v20 = vmul.f32 %v75_v15, %v75_v15  ;;  %v93_v21 = vmul.f32 %v91_v16, %v73_v11 }
  0xb9   :  { %v84_v22 = vmul.f32 2.0, %v72_v18  ;;  %v89_v23 = vsub.f32 %v63_v17, %v87_v19  ;;  %v81_v24 = vsel %vm56_vm0, %v77_v20, 0.0  ;;  %v74_v25 = vsub.f32 %v52_v2, %v72_v18 }
  0xba   :  { %82 = vadd.xlane.f32.xlu1 %v81_v24  ;;  %v90_v26 = vmul.f32 16.0, %v72_v18  ;;  %v120_v58 = vsub.f32 %v301_v0, %v72_v18 }
  0xbb   :  { %v86_v27 = vmul.f32 %v84_v22, %v59_v8  ;;  %v76_v28 = vmul.f32 %v74_v25, %v74_v25  ;;  %v95_v29 = vadd.f32 %v93_v21, %v89_v23 }
  0xbc   :  { %v92_v32 = vmul.f32 %v90_v26, %v72_v18 }
  0xbd   :  { %v88_v30 = vsub.f32 %v63_v17, %v86_v27  ;;  %v78_v31 = vsel %vm56_vm0, %v76_v28, 0.0 }
  0xbe   :  { %79 = vadd.xlane.f32.xlu0 %v78_v31 }
  0xbf   :  { %v94_v33 = vadd.f32 %v92_v32, %v88_v30 }
 0x143   :  { %v83_v34 = vpop.xlane.xlu1 %82 }
 0x144   :  { %v97_v35 = vadd.f32 %v95_v29, %v83_v34 }
 0x146   :  { %v99_v36 = vmul.f32 0.03125, %v97_v35 }
 0x147   :  { %v80_v37 = vpop.xlane.xlu0 %79 }
 0x148   :  { %v101_v38 = vadd.f32 1e-05, %v99_v36  ;;  %v96_v39 = vadd.f32 %v94_v33, %v80_v37 }
 0x14a   :  { %172 = vrsqrt.f32 %v101_v38  ;;  %v98_v40 = vmul.f32 0.03125, %v96_v39 }
 0x14c   :  { %v100_v42 = vadd.f32 1e-05, %v98_v40 }
 0x14e   :  { %174 = vrsqrt.f32 %v100_v42 }
 0x157   :  { %v173_v52 = vpop.eup %172 }
 0x158   :  { %v123_v53 = vmul.f32 %v173_v52, %v121_v50  ;;  %v105_v55 = vmul.f32 %v173_v52, %v75_v15 }
 0x15a   :  { %v129_v57 = vmul.f32 %v127_v51, %v123_v53  ;;  %v111_v59 = vmul.f32 %v109_v49, %v105_v55 }
 0x15b   :  { %v175_v60 = vpop.eup %174 }
 0x15c   :  { %v135_v61 = vadd.f32 %v133_v54, %v129_v57  ;;  %v122_v62 = vmul.f32 %v175_v60, %v120_v58  ;;  %v104_v63 = vmul.f32 %v175_v60, %v74_v25  ;;  %v117_v1 = vadd.f32 %v115_v56, %v111_v59 }
 0x15e   :  { %140 = vrot.lane.b32.xlu1 %v135_v61, %s267_s0  ;;  %v128_v2 = vmul.f32 %v127_v51, %v122_v62  ;;  %v110_v3 = vmul.f32 %v109_v49, %v104_v63  ;;  %119 = vst.msk [vmem:[#allocation8 + $0x8] sm:$0xff] %vm56_vm0, %v117_v1 }
 0x160   :  { %v134_v4 = vadd.f32 %v133_v54, %v128_v2  ;;  %v116_v5 = vadd.f32 %v115_v56, %v110_v3 }
 0x162   :  { %138 = vrot.lane.b32.xlu0 %v134_v4, %s267_s0  ;;  %118 = vst.msk [vmem:[#allocation8] sm:$0xff] %vm56_vm0, %v116_v5 }
 0x1d0   :  { %v141_v6 = vpop.permute.xlu1 %140 }
 0x1d1   :  { %146 = vst.msk [vmem:[#allocation8 + $0x8] sm:$0xff] %vm144_vm1, %v141_v6 }
 0x1d4   :  { %v139_v0 = vpop.permute.xlu0 %138 }
 0x1d5   :  { %145 = vst.msk [vmem:[#allocation8] sm:$0xff] %vm144_vm1, %v139_v0 }
 0x1d6   :  { %247 = shalt.err (!%p244_p5)
}
 0x1d7   :  { %158 = dma.vmem_to_hbm [thread:$0]  %s153_s28, 256, %s325_s3, [#allocation4], %s264_s20, %s264_s20, %s265_s21  }
 0x1d8   :  { %260 = dma.done.wait [#allocation4], 256  }
 0x1d9   :  { %261 = vsyncadd [#allocation4], 4294967040 }
 0x1da   :  { %162 = vsyncpa [#allocation3], 1 }
 0x1db   :  { %163 = vsyncpa [#allocation6], 1 }
 0x1dc   :  { %164 = vsyncpa [#allocation4], 1 }

</bundles_post_ra>
